<compile_context>
chip_gen: v7x
topology: tpu7x:2x2x1
jax: 0.10.0
libtpu: 0.0.40
codegen_flags: <defaults>
</compile_context>

<pallas_src>
import functools

import jax
import jax.numpy as jnp
from jax.experimental import pallas as pl
from jax.experimental.pallas import tpu as pltpu


def _round_up(n: int, m: int) -> int:
    return ((n + m - 1) // m) * m


def lin3_kernel(x_ref, w1_ref, b1_ref, w23_ref, b23_ref, o_ref):
    # fc1: bf16 MXU matmul with fp32 accumulation, then bias + ReLU in fp32.
    h = jnp.dot(x_ref[...], w1_ref[...], preferred_element_type=jnp.float32)
    h = jnp.maximum(h + b1_ref[...], 0.0)
    # dropout1: eval-mode identity.
    # fc2 -> fc3 fused into one affine map (forward() applies no act2).
    out = jnp.dot(h.astype(w23_ref.dtype), w23_ref[...],
                  preferred_element_type=jnp.float32)
    out = out + b23_ref[...]
    # dropout2: eval-mode identity.
    o_ref[...] = out.astype(o_ref.dtype)


@functools.partial(jax.jit, static_argnames=("tile_b", "use_bf16"))
def lin3_forward(x, w1, b1, w2, b2, w3, b3, *, tile_b=512, use_bf16=True):
    """x: (B, in_features); w_i stored as (in_dim, out_dim); b_i as (1, out_dim)."""
    B, in_features = x.shape
    fc2_in = w1.shape[1]
    out_dim = w3.shape[1]
    out_dtype = x.dtype

    # ---- Algebraic fc2.fc3 fusion (fp32, done once outside the kernel) ----
    w2f = w2.astype(jnp.float32)
    w3f = w3.astype(jnp.float32)
    w23 = w2f @ w3f                                               # (fc2_in, out_dim)
    b23 = b2.astype(jnp.float32) @ w3f + b3.astype(jnp.float32)   # (1, out_dim)

    # ---- dtype prep: bf16 streaming operands, fp32 biases ----
    compute_dtype = jnp.bfloat16 if use_bf16 else x.dtype
    xk = x.astype(compute_dtype)
    w1k = w1.astype(compute_dtype)
    w23k = w23.astype(compute_dtype)
    b1k = b1.astype(jnp.float32)
    b23k = b23.astype(jnp.float32)

    # ---- batch tiling: tile is sublane-aligned (multiple of 8) and divides Bp ----
    tb = min(tile_b, _round_up(B, 8))
    Bp = _round_up(B, tb)
    if Bp != B:
        xk = jnp.pad(xk, ((0, Bp - B), (0, 0)))
    grid = (Bp // tb,)

    elem = jnp.dtype(compute_dtype).itemsize
    cost = pl.CostEstimate(
        flops=2 * Bp * (in_features * fc2_in + fc2_in * out_dim),
        transcendentals=0,
        bytes_accessed=(Bp * in_features * elem                          # x in
                        + Bp * out_dim * jnp.dtype(out_dtype).itemsize   # out
                        + (in_features * fc2_in + fc2_in * out_dim) * elem
                        + (fc2_in + out_dim) * 4),                       # biases
    )

    # Weights/biases: full block, constant index_map -> loaded once, VMEM-resident.
    def const_spec(a):
        return pl.BlockSpec(a.shape, lambda i: (0,) * a.ndim)

    out_padded = pl.pallas_call(
        lin3_kernel,
        out_shape=jax.ShapeDtypeStruct((Bp, out_dim), out_dtype),
        grid=grid,
        in_specs=[
            pl.BlockSpec((tb, in_features), lambda i: (i, 0)),  # x: batch-tiled
            const_spec(w1k),
            const_spec(b1k),
            const_spec(w23k),
            const_spec(b23k),
        ],
        out_specs=pl.BlockSpec((tb, out_dim), lambda i: (i, 0)),
        compiler_params=pltpu.CompilerParams(
            dimension_semantics=("parallel",)),
        cost_estimate=cost,
    )(xk, w1k, b1k, w23k, b23k)

    return out_padded[:B] if Bp != B else out_padded


def init_linear_params(key, in_dim, out_dim, dtype=jnp.float32):
    """Deterministic PyTorch-style init: U(-1/sqrt(in_dim), 1/sqrt(in_dim))."""
    kw, kb = jax.random.split(key)
    bound = 1.0 / float(in_dim) ** 0.5
    # stored as (in_dim, out_dim) == W^T of PyTorch's (out_dim, in_dim)
    w = jax.random.uniform(kw, (in_dim, out_dim), dtype, -bound, bound)
    b = jax.random.uniform(kb, (1, out_dim), dtype, -bound, bound)
    return w, b


if __name__ == "__main__":
    # Small shapes consistent with the module: Lin3(in_features=32, fc2_in=64,
    # fc3_in=48, output=16, dropout_rate=0.5), batch=8.
    batch, in_features, fc2_in, fc3_in, output = 8, 32, 64, 48, 16

    key = jax.random.PRNGKey(0)
    kx, k1, k2, k3 = jax.random.split(key, 4)

    x = jax.random.normal(kx, (batch, in_features), jnp.float32)
    w1, b1 = init_linear_params(k1, in_features, fc2_in)
    w2, b2 = init_linear_params(k2, fc2_in, fc3_in)
    w3, b3 = init_linear_params(k3, fc3_in, output)

    y = lin3_forward(x, w1, b1, w2, b2, w3, b3)
    jax.block_until_ready(y)
    assert y.shape == (batch, output)

    # Reference 1: same bf16/fused-weight recipe in pure JAX (tight check).
    w23 = w2 @ w3
    b23 = b2 @ w3 + b3
    hb = jnp.maximum(
        jnp.dot(x.astype(jnp.bfloat16), w1.astype(jnp.bfloat16),
                preferred_element_type=jnp.float32) + b1, 0.0)
    ref_bf16 = jnp.dot(hb.astype(jnp.bfloat16), w23.astype(jnp.bfloat16),
                       preferred_element_type=jnp.float32) + b23
    assert bool(jnp.allclose(y, ref_bf16, atol=1e-2, rtol=1e-2))

    # Reference 2: exact fp32 eval-mode forward of the PyTorch module (loose
    # check; guards semantics: relu(fc1) -> fc2 -> fc3, dropout = identity).
    h = jnp.maximum(x @ w1 + b1, 0.0)
    ref_f32 = (h @ w2 + b2) @ w3 + b3
    assert bool(jnp.allclose(y, ref_f32, atol=5e-2, rtol=5e-2))

    print("KERNEL_OK")
</pallas_src>

<mosaic_0001>
module attributes {stable_mosaic.version = 11 : i64} {
  func.func @lin3_kernel(%arg0: i32, %arg1: memref<8x32xbf16, #tpu.memory_space<vmem>>, %arg2: memref<32x64xbf16, #tpu.memory_space<vmem>>, %arg3: memref<1x64xf32, #tpu.memory_space<vmem>>, %arg4: memref<64x16xbf16, #tpu.memory_space<vmem>>, %arg5: memref<1x16xf32, #tpu.memory_space<vmem>>, %arg6: memref<8x16xf32, #tpu.memory_space<vmem>>) attributes {dimension_semantics = [#tpu.dimension_semantics<parallel>], iteration_bounds = array<i64: 1>, scalar_prefetch = 0 : i64, scratch_operands = 0 : i64, tpu.core_type = #tpu.core_type<tc>, window_params = [{transform_indices = @transform_0, window_bounds = array<i64: 8, 32>}, {pipeline_mode = #tpu.pipeline_mode<synchronous>, transform_indices = @transform_1, window_bounds = array<i64: 32, 64>}, {pipeline_mode = #tpu.pipeline_mode<synchronous>, transform_indices = @transform_2, window_bounds = array<i64: 1, 64>}, {pipeline_mode = #tpu.pipeline_mode<synchronous>, transform_indices = @transform_3, window_bounds = array<i64: 64, 16>}, {pipeline_mode = #tpu.pipeline_mode<synchronous>, transform_indices = @transform_4, window_bounds = array<i64: 1, 16>}, {transform_indices = @transform_5, window_bounds = array<i64: 8, 16>}]} {
    %c0 = arith.constant 0 : index
    %c0_0 = arith.constant 0 : index
    %0 = vector.load %arg1[%c0, %c0_0] : memref<8x32xbf16, #tpu.memory_space<vmem>>, vector<8x32xbf16>
    %c0_1 = arith.constant 0 : index
    %c0_2 = arith.constant 0 : index
    %1 = vector.load %arg2[%c0_1, %c0_2] : memref<32x64xbf16, #tpu.memory_space<vmem>>, vector<32x64xbf16>
    %cst = arith.constant dense<0.000000e+00> : vector<8x64xf32>
    %2 = tpu.matmul %0, %1, %cst {dimension_numbers = #tpu.dot_dimension_numbers<[1], [0], [0], [1], [0, 0, 1, 1], [], []>} : vector<8x32xbf16>, vector<32x64xbf16>, vector<8x64xf32> -> vector<8x64xf32>
    %c0_3 = arith.constant 0 : index
    %c0_4 = arith.constant 0 : index
    %3 = vector.load %arg3[%c0_3, %c0_4] : memref<1x64xf32, #tpu.memory_space<vmem>>, vector<1x64xf32>
    %4 = vector.broadcast %3 : vector<1x64xf32> to vector<8x64xf32>
    %5 = arith.addf %2, %4 : vector<8x64xf32>
    %cst_5 = arith.constant 0.000000e+00 : f32
    %6 = vector.broadcast %cst_5 : f32 to vector<8x64xf32>
    %7 = arith.maximumf %5, %6 : vector<8x64xf32>
    %8 = arith.truncf %7 : vector<8x64xf32> to vector<8x64xbf16>
    %c0_6 = arith.constant 0 : index
    %c0_7 = arith.constant 0 : index
    %9 = vector.load %arg4[%c0_6, %c0_7] : memref<64x16xbf16, #tpu.memory_space<vmem>>, vector<64x16xbf16>
    %cst_8 = arith.constant dense<0.000000e+00> : vector<8x16xf32>
    %10 = tpu.matmul %8, %9, %cst_8 {dimension_numbers = #tpu.dot_dimension_numbers<[1], [0], [0], [1], [0, 0, 1, 1], [], []>} : vector<8x64xbf16>, vector<64x16xbf16>, vector<8x16xf32> -> vector<8x16xf32>
    %c0_9 = arith.constant 0 : index
    %c0_10 = arith.constant 0 : index
    %11 = vector.load %arg5[%c0_9, %c0_10] : memref<1x16xf32, #tpu.memory_space<vmem>>, vector<1x16xf32>
    %12 = vector.broadcast %11 : vector<1x16xf32> to vector<8x16xf32>
    %13 = arith.addf %10, %12 : vector<8x16xf32>
    %c0_11 = arith.constant 0 : index
    %c0_12 = arith.constant 0 : index
    %14 = vector.load %arg6[%c0_11, %c0_12] : memref<8x16xf32, #tpu.memory_space<vmem>>, vector<8x16xf32>
    tpu.vector_store %arg6[%c0_11, %c0_12], %13 {strides = array<i32>} : memref<8x16xf32, #tpu.memory_space<vmem>>, vector<8x16xf32>,
    return
  }
  func.func @transform_0(%arg0: i32) -> (i32, i32) {
    %c0_i32 = arith.constant 0 : i32
    %c0_i32_0 = arith.constant 0 : i32
    return %arg0, %c0_i32 : i32, i32
  }
  func.func @transform_1(%arg0: i32) -> (i32, i32) {
    %c0_i32 = arith.constant 0 : i32
    %c0_i32_0 = arith.constant 0 : i32
    %c0_i32_1 = arith.constant 0 : i32
    return %c0_i32, %c0_i32_0 : i32, i32
  }
  func.func @transform_2(%arg0: i32) -> (i32, i32) {
    %c0_i32 = arith.constant 0 : i32
    %c0_i32_0 = arith.constant 0 : i32
    %c0_i32_1 = arith.constant 0 : i32
    return %c0_i32, %c0_i32_0 : i32, i32
  }
  func.func @transform_3(%arg0: i32) -> (i32, i32) {
    %c0_i32 = arith.constant 0 : i32
    %c0_i32_0 = arith.constant 0 : i32
    %c0_i32_1 = arith.constant 0 : i32
    return %c0_i32, %c0_i32_0 : i32, i32
  }
  func.func @transform_4(%arg0: i32) -> (i32, i32) {
    %c0_i32 = arith.constant 0 : i32
    %c0_i32_0 = arith.constant 0 : i32
    %c0_i32_1 = arith.constant 0 : i32
    return %c0_i32, %c0_i32_0 : i32, i32
  }
  func.func @transform_5(%arg0: i32) -> (i32, i32) {
    %c0_i32 = arith.constant 0 : i32
    %c0_i32_0 = arith.constant 0 : i32
    return %arg0, %c0_i32 : i32, i32
  }
}

</mosaic_0001>

<bundles_post_ra>
// kernel: lin3_forward.1
= control target key start
LH: loop header
LB: loop body
LE: loop exit
PB: predicated region body
PF: predicated region fallthrough
CT: control target
= control target key end

     0   :  { %v262_v1 = vmov 0.0   ;;  %vm263_vm0 = vmmov 0   ;;  %vm46_vm1 = vcmask 261120   ;;  %s334_s0 = inlined_call_operand.vmem [shape: bf16[8,32], index: 0, kind: input, shape index: {}]   ;;  %s335_s1 = inlined_call_operand.vmem [shape: bf16[32,64], index: 1, kind: input, shape index: {}]   ;;  %s336_s2 = inlined_call_operand.vmem [shape: f32[1,64], index: 2, kind: input, shape index: {}]   ;;  %s337_s3 = inlined_call_operand.vmem [shape: bf16[64,16], index: 3, kind: input, shape index: {}]   ;;  %s338_s4 = inlined_call_operand.vmem [shape: f32[1,16], index: 4, kind: input, shape index: {}]   ;;  %s339_s5 = inlined_call_operand.hbm [shape: f32[8,16], index: 5, kind: output, shape index: {}]  }
   0x1   :  { %v232_v0 = vld [vmem:[%s335_s1] sm:$0xff]   ;;  %209 = vmatprep.subr.bf16.mxu0 %v262_v1  ;;  %217 = vmatprep.subr.bf16.mxu1 %v262_v1  ;;  %v233_v2 = vld [vmem:[%s335_s1 + $0x8] sm:$0xff]  }
   0x2   :  { %210 = vmatpush3.bf16.msra.mxu0 %v232_v0  ;;  %213 = vmatprep.mubr.msk.bf16.mxu0 %vm263_vm0, %v262_v1  ;;  %v234_v3 = vld [vmem:[%s337_s3] sm:$0xff]   ;;  %v235_v4 = vld [vmem:[%s337_s3 + $0x8] sm:$0xff]  }
   0x3   :  { %211 = vmatprep.subr.bf16.mxu0 %v262_v1  ;;  %225 = vmatprep.mubr.msk.bf16.mxu1 %vm263_vm0, %v262_v1  ;;  %v22_v5 = vld [vmem:[%s334_s0] sm:$0xf] }
   0x4   :  { %218 = vmatpush3.bf16.msra.mxu1 %v234_v3 }
   0x5   :  { %219 = vmatprep.subr.bf16.mxu1 %v262_v1 }
   0x6   :  { %212 = vmatpush3.bf16.msra.mxu0 %v233_v2 }
   0x7   :  { %10 = vsyncpa [#allocation3], 0  ;;  %v236_v6 = vld [vmem:[%s337_s3 + $0x10] sm:$0xff]   ;;  %v237_v7 = vld [vmem:[%s337_s3 + $0x18] sm:$0xff]   ;;  %vm131_vm2 = vcmask 523264   ;;  %s264_s9 = smov [#allocation2]  }
   0x8   :  { %220 = vmatpush3.bf16.msra.mxu1 %v235_v4  ;;  %v191_v8 = vld [vmem:[%s336_s2] ss:$0 sm:$0xff]  ;;  %s183_s3 = sshll.u32 %s264_s9, 4  ;;  %vm175_vm3 = vcmask 130048   ;;  %s184_s3 = int_to_ptr.vmem [resolvable:$true] %s183_s3 }
   0x9   :  { %214 = vmatmul.mubr.msk.bf16.vlgmr.msra.gmra.mrb[0].mxu0 %vm46_vm1, %v22_v5  ;;  %221 = vmatprep.subr.bf16.mxu1 %v262_v1  ;;  %v195_v16 = vld [vmem:[%s338_s4] ss:$0 sm:$0xff]  ;;  %s238_s2 = scalar_lea.vmem %s184_s3, 128  ;;  %p243_p1 = scmp.lt.s32.totalorder %s184_s3, %s184_s3 }
   0xa   :  { %p239_p0 = scmp.ne.s32.totalorder %s184_s3, %s238_s2  ;;  %p244_p2 = scmp.lt.s32.totalorder %s238_s2, %s238_s2 }
   0xc   :  { %222 = vmatpush3.bf16.msra.mxu1 %v236_v6  ;;  %p245_p3 = por %p244_p2, %p243_p1 }
   0xd   :  { %223 = vmatprep.subr.bf16.mxu1 %v262_v1 }
   0xe   :  { %p246_p4 = pnand %p245_p3, %p239_p0 }
  0x10   :  { %224 = vmatpush3.bf16.msra.mxu1 %v237_v7 }
  0xdc   :  { %v84_v9 = vpop.f32.mrb[0].mxu0 }
  0xdd   :  { %v85_v10 = vadd.f32 %v191_v8, %v84_v9  ;;  %v215_v11 = vpop.f32.mrb[1].mxu0 }
  0xde   :  { %v87_v12 = vpop.f32.mrb[2].mxu0 }
  0xdf   :  { %v90_v13 = vmax.f32 %v85_v10, 0.0  ;;  %v216_v14 = vpop.f32.mrb[3].mxu0 }
  0xe1   :  { %v91_v15 = vpack.c.bf16 %v90_v13, %v90_v13 }
  0xe3   :  { %226 = vmatmul.mubr.msk.bf16.vlgmr.msra.gmra.mrb[0].mxu1 %vm131_vm2, %v91_v15 }
 0x1b6   :  { %v169_v17 = vpop.f32.mrb[0].mxu1 }
 0x1b7   :  { %v170_v18 = vadd.f32 %v195_v16, %v169_v17  ;;  %v227_v19 = vpop.f32.mrb[1].mxu1 }
 0x1b8   :  { %v172_v20 = vpop.f32.mrb[2].mxu1 }
 0x1b9   :  { %v228_v21 = vpop.f32.mrb[3].mxu1  ;;  %176 = vst.msk [vmem:[#allocation2] sm:$0xff] %vm175_vm3, %v170_v18 }
 0x1ba   :  { %249 = shalt.err (!%p246_p4)
}
 0x1bb   :  { %s250_s4 = scalar_lea.hbm %s339_s5, 128 }
 0x1bc   :  { %p251_p5 = scmp.ne.s32.totalorder %s339_s5, %s250_s4  ;;  %p254_p6 = scmp.lt.u32.totalorder %s250_s4, %s339_s5 }
 0x1be   :  { %p256_p7 = pnand %p254_p6, %p251_p5 }
 0x1c0   :  { %259 = shalt.err (!%p256_p7)
}
 0x1c1   :  { %186 = dma.vmem_to_hbm [thread:$0]  %s184_s3, 128, %s339_s5, [#allocation3]  }
 0x1c2   :  { %260 = dma.done.wait [#allocation3], 128  }
 0x1c3   :  { %261 = vsyncadd [#allocation3], 4294967168 }
 0x1c4   :  { %190 = vsyncpa [#allocation3], 1 }

</bundles_post_ra>
